<compile_context>
chip_gen: v5e
topology: v5e:2x2
jax: 0.10.0
libtpu: 0.0.40
codegen_flags: <defaults>
</compile_context>

<pallas_src>
import jax
import jax.numpy as jnp
from jax import lax
from jax.experimental import pallas as pl
from jax.experimental.pallas import tpu as pltpu


# ---------------------------------------------------------------------------
# helpers
# ---------------------------------------------------------------------------
def _pick_tile(dim, pref, quantum):
    """Largest tile <= pref that evenly divides `dim`, preferring multiples of
    `quantum` (8 for sublane axes, 128 for lane axes).  Full dim when dim <= pref.
    # TODO(synk): masked tail tiles (pl.cdiv grid + in-kernel masking) for dims with
    #             no usable divisor instead of the largest-divisor fallback.
    """
    if dim <= pref:
        return dim
    fallback = dim
    for cand in range(pref, 0, -1):
        if dim % cand == 0:
            if cand % quantum == 0:
                return cand
            if fallback == dim:
                fallback = cand
    return fallback


def _vmem_limit(bytes_est):
    # Default scoped VMEM is 16/32 MiB (v5e / v6e,v7x); set an explicit limit with
    # headroom, capped at 64 MiB so it stays valid on v7x as well.
    return int(min(64 * 2 ** 20, max(32 * 2 ** 20, 2 * bytes_est)))


# ---------------------------------------------------------------------------
# Tiled linear kernel:  y = x @ W^T + b   (torch (out_features, in_features) layout)
#   bf16 MXU inputs + f32 accumulation.  f32 output accumulates straight into the
#   output block (no scratch); bf16 output keeps an f32 accumulator, cast at last k.
# ---------------------------------------------------------------------------
def tc_linear(x, w, b, *, out_dtype=jnp.float32, compute_dtype=jnp.bfloat16,
              tm=256, tn=256, tk=512):
    M, K = x.shape
    Nout = w.shape[0]
    tm = _pick_tile(M, tm, 8)
    tn = _pick_tile(Nout, tn, 128)
    tk = _pick_tile(K, tk, 128)
    grid = (M // tm, Nout // tn, K // tk)

    def _acc_step(x_ref, w_ref, acc):
        acc[...] += lax.dot_general(
            x_ref[...], w_ref[...],
            dimension_numbers=(((1,), (1,)), ((), ())),   # x @ W^T, no transpose op
            preferred_element_type=jnp.float32)

    if out_dtype == jnp.float32:
        def kernel(x_ref, w_ref, b_ref, o_ref):
            @pl.when(pl.program_id(2) == 0)
            def _():
                o_ref[...] = jnp.zeros_like(o_ref)
            _acc_step(x_ref, w_ref, o_ref)

            @pl.when(pl.program_id(2) == pl.num_programs(2) - 1)
            def _():
                o_ref[...] += b_ref[...]
        scratch = []
    else:
        def kernel(x_ref, w_ref, b_ref, o_ref, acc_ref):
            @pl.when(pl.program_id(2) == 0)
            def _():
                acc_ref[...] = jnp.zeros_like(acc_ref)
            _acc_step(x_ref, w_ref, acc_ref)

            @pl.when(pl.program_id(2) == pl.num_programs(2) - 1)
            def _():
                o_ref[...] = (acc_ref[...] + b_ref[...]).astype(o_ref.dtype)
        scratch = [pltpu.VMEM((tm, tn), jnp.float32)]

    out_isz = 2 if out_dtype == jnp.bfloat16 else 4
    bytes_est = 2 * (tm * tk + tn * tk) * 2 + 2 * tm * tn * out_isz + tm * tn * 4
    cost = pl.CostEstimate(
        flops=int(2 * M * Nout * K), transcendentals=0,
        bytes_accessed=int((M * K + Nout * K) * 2 + Nout * 4 + M * Nout * out_isz))

    return pl.pallas_call(
        kernel,
        grid=grid,
        in_specs=[
            pl.BlockSpec((tm, tk), lambda i, j, k: (i, k)),
            pl.BlockSpec((tn, tk), lambda i, j, k: (j, k)),
            pl.BlockSpec((1, tn), lambda i, j, k: (0, j)),
        ],
        out_specs=pl.BlockSpec((tm, tn), lambda i, j, k: (i, j)),
        out_shape=jax.ShapeDtypeStruct((M, Nout), out_dtype),
        scratch_shapes=scratch,
        compiler_params=pltpu.CompilerParams(
            dimension_semantics=("parallel", "parallel", "arbitrary"),
            vmem_limit_bytes=_vmem_limit(bytes_est)),
        cost_estimate=cost,
    )(x.astype(compute_dtype), w.astype(compute_dtype),
      b.reshape(1, Nout).astype(jnp.float32))


# ---------------------------------------------------------------------------
# Flash attention (need_weights=False): kv-tiled online softmax.
#   q_arr/k_arr/v_arr: (len, batch, G, H, Dh) bf16 views straight off the projection
#   output (no HBM relayout); sel = (q_g, k_g, v_g) selects the G slice.
#   Output is lane-dense (batch, L, E) with heads merged in-kernel.
# ---------------------------------------------------------------------------
def tc_attention_flash(q_arr, k_arr, v_arr, sel, *, block_q=256, block_kv=256,
                       out_dtype=jnp.bfloat16):
    q_sel, k_sel, v_sel = sel
    L, N, _, H, Dh = q_arr.shape
    S = k_arr.shape[0]
    E = H * Dh
    tq = _pick_tile(L, block_q, 8)
    tkv = _pick_tile(S, block_kv, 8)

    def kernel(q_ref, k_ref, v_ref, o_ref, m_sc, l_sc, acc_sc):
        s_idx = pl.program_id(2)

        @pl.when(s_idx == 0)
        def _():
            m_sc[...] = jnp.full(m_sc.shape, -jnp.inf, dtype=m_sc.dtype)
            l_sc[...] = jnp.zeros(l_sc.shape, dtype=l_sc.dtype)
            acc_sc[...] = jnp.zeros(acc_sc.shape, dtype=acc_sc.dtype)

        # (len, 1, 1, H, Dh) -> (H, len, Dh): head split is in-kernel layout plumbing
        # (XLU), not an HBM relayout.
        q = jnp.transpose(q_ref[...][:, 0, 0], (1, 0, 2))
        k = jnp.transpose(k_ref[...][:, 0, 0], (1, 0, 2))
        v = jnp.transpose(v_ref[...][:, 0, 0], (1, 0, 2))

        s = jnp.einsum("htd,hsd->hts", q, k,
                       preferred_element_type=jnp.float32)     # bf16 MXU, f32 acc
        m_prev = m_sc[...]
        m_new = jnp.maximum(m_prev, jnp.max(s, axis=-1, keepdims=True))
        alpha = jnp.exp(m_prev - m_new)                         # f32 softmax stats
        p = jnp.exp(s - m_new)
        l_sc[...] = alpha * l_sc[...] + jnp.sum(p, axis=-1, keepdims=True)
        acc_sc[...] = alpha * acc_sc[...] + jnp.einsum(
            "hts,hsd->htd", p.astype(v.dtype), v,
            preferred_element_type=jnp.float32)
        m_sc[...] = m_new
        # TODO(synk): bf16 exp on v6e/v7x if the single EUP slot becomes binding.

        @pl.when(s_idx == pl.num_programs(2) - 1)
        def _():
            o = acc_sc[...] * pl.reciprocal(l_sc[...], approx=True)   # (H, tq, Dh)
            for h in range(H):          # merge heads -> lane-dense (tq, E) store
                o_ref[0, :, h * Dh:(h + 1) * Dh] = o[h].astype(o_ref.dtype)

    bytes_est = (2 * (tq + 2 * tkv) * H * max(Dh, 128) * 2      # dbl-buffered q/k/v
                 + 2 * tq * E * 2                               # output block
                 + (2 * 128 + max(Dh, 128)) * H * tq * 4        # m/l/acc scratch
                 + 4 * H * tq * tkv * 4)                        # score temporaries
    cost = pl.CostEstimate(
        flops=int(4 * N * H * L * S * Dh),
        transcendentals=int(N * H * L * S),
        bytes_accessed=int((N * L * E + 2 * N * S * E) * 2 + N * L * E * 2))

    return pl.pallas_call(
        kernel,
        grid=(N, L // tq, S // tkv),
        in_specs=[
            pl.BlockSpec((tq, 1, 1, H, Dh), lambda n, t, s: (t, n, q_sel, 0, 0)),
            pl.BlockSpec((tkv, 1, 1, H, Dh), lambda n, t, s: (s, n, k_sel, 0, 0)),
            pl.BlockSpec((tkv, 1, 1, H, Dh), lambda n, t, s: (s, n, v_sel, 0, 0)),
        ],
        out_specs=pl.BlockSpec((1, tq, E), lambda n, t, s: (n, t, 0)),
        out_shape=jax.ShapeDtypeStruct((N, L, E), out_dtype),
        scratch_shapes=[
            pltpu.VMEM((H, tq, 1), jnp.float32),     # running max
            pltpu.VMEM((H, tq, 1), jnp.float32),     # running denom
            pltpu.VMEM((H, tq, Dh), jnp.float32),    # output accumulator
        ],
        compiler_params=pltpu.CompilerParams(
            dimension_semantics=("parallel", "parallel", "arbitrary"),
            vmem_limit_bytes=_vmem_limit(bytes_est)),
        cost_estimate=cost,
    )(q_arr, k_arr, v_arr)


# ---------------------------------------------------------------------------
# Attention with head-averaged weights (need_weights=True, average_attn_weights=True).
#   Full S per step (weights must be materialized anyway); exact softmax division for
#   PyTorch parity; head-mean computed in-kernel (H x less HBM writeback).
# ---------------------------------------------------------------------------
def tc_attention_with_weights(q_arr, k_arr, v_arr, sel, *, block_q=256,
                              out_dtype=jnp.bfloat16):
    # TODO(synk): two-pass (stats, then weights) variant to bound VMEM for very long S.
    q_sel, k_sel, v_sel = sel
    L, N, _, H, Dh = q_arr.shape
    S = k_arr.shape[0]
    E = H * Dh
    tq = _pick_tile(L, block_q, 8)

    def kernel(q_ref, k_ref, v_ref, o_ref, wmean_ref):
        q = jnp.transpose(q_ref[...][:, 0, 0], (1, 0, 2))    # (H, tq, Dh)
        k = jnp.transpose(k_ref[...][:, 0, 0], (1, 0, 2))    # (H, S, Dh)
        v = jnp.transpose(v_ref[...][:, 0, 0], (1, 0, 2))

        s = jnp.einsum("htd,hsd->hts", q, k,
                       preferred_element_type=jnp.float32)    # (H, tq, S) f32
        m = jnp.max(s, axis=-1, keepdims=True)
        e = jnp.exp(s - m)
        l = jnp.sum(e, axis=-1, keepdims=True)
        w = e / l                                             # exact softmax (parity)
        wmean_ref[0] = jnp.mean(w, axis=0)                    # (tq, S) head mean

        o = jnp.einsum("hts,hsd->htd", w.astype(v.dtype), v,
                       preferred_element_type=jnp.float32)    # (H, tq, Dh)
        for h in range(H):              # merge heads -> lane-dense (tq, E) store
            o_ref[0, :, h * Dh:(h + 1) * Dh] = o[h].astype(o_ref.dtype)

    bytes_est = (2 * (tq + 2 * S) * H * max(Dh, 128) * 2
                 + 2 * tq * E * 2 + 2 * tq * S * 4
                 + 4 * H * tq * S * 4)
    cost = pl.CostEstimate(
        flops=int(4 * N * H * L * S * Dh),
        transcendentals=int(N * H * L * S),
        bytes_accessed=int((N * L * E + 2 * N * S * E) * 2
                           + N * L * E * 2 + N * L * S * 4))

    return pl.pallas_call(
        kernel,
        grid=(N, L // tq),
        in_specs=[
            pl.BlockSpec((tq, 1, 1, H, Dh), lambda n, t: (t, n, q_sel, 0, 0)),
            pl.BlockSpec((S, 1, 1, H, Dh), lambda n, t: (0, n, k_sel, 0, 0)),
            pl.BlockSpec((S, 1, 1, H, Dh), lambda n, t: (0, n, v_sel, 0, 0)),
        ],
        out_specs=[
            pl.BlockSpec((1, tq, E), lambda n, t: (n, t, 0)),
            pl.BlockSpec((1, tq, S), lambda n, t: (n, t, 0)),
        ],
        out_shape=(jax.ShapeDtypeStruct((N, L, E), out_dtype),
                   jax.ShapeDtypeStruct((N, L, S), jnp.float32)),
        compiler_params=pltpu.CompilerParams(
            dimension_semantics=("parallel", "parallel"),
            vmem_limit_bytes=_vmem_limit(bytes_est)),
        cost_estimate=cost,
    )(q_arr, k_arr, v_arr)


# ---------------------------------------------------------------------------
# Module forward (glue in plain JAX; all reshapes are layout-free views)
# ---------------------------------------------------------------------------
def mha_forward(params, query, key, value, num_heads, *, need_weights=True,
                block_q=256, block_kv=256):
    """TensorCoreMultiheadAttention.forward (batch_first=False, attn_mask=None,
    key_padding_mask=None, dropout=0.0, average_attn_weights=True).

    query: (L, N, E); key/value: (S, N, kdim/vdim).
    Returns (attn_output (L, N, E) f32, attn_weights (S, L, N) f32 or None).
    """
    L, N, E = query.shape
    S = key.shape[0]
    H = num_heads
    Dh = E // H
    scaling = float(Dh) ** -0.5

    # Fold 1/sqrt(Dh) into the q projection: (x W^T + b) * s == x (sW)^T + s*b.
    q_w = params["q_w"] * scaling
    q_b = params["q_b"] * scaling

    if (key is query) and (value is query):
        # Self-attention: fused QKV — one kernel reads the activations once; the
        # (M, 3E) bf16 result is viewed as (L, N, 3, H, Dh) with zero HBM relayout.
        w_cat = jnp.concatenate([q_w, params["k_w"], params["v_w"]], axis=0)
        b_cat = jnp.concatenate([q_b, params["k_b"], params["v_b"]], axis=0)
        qkv = tc_linear(query.reshape(-1, E), w_cat, b_cat, out_dtype=jnp.bfloat16)
        qkv = qkv.reshape(L, N, 3, H, Dh)
        q_arr = k_arr = v_arr = qkv
        sel = (0, 1, 2)
    else:
        q = tc_linear(query.reshape(-1, E), q_w, q_b, out_dtype=jnp.bfloat16)
        k = tc_linear(key.reshape(-1, key.shape[-1]), params["k_w"], params["k_b"],
                      out_dtype=jnp.bfloat16)
        v = tc_linear(value.reshape(-1, value.shape[-1]), params["v_w"], params["v_b"],
                      out_dtype=jnp.bfloat16)
        q_arr = q.reshape(L, N, 1, H, Dh)
        k_arr = k.reshape(S, N, 1, H, Dh)
        v_arr = v.reshape(S, N, 1, H, Dh)
        sel = (0, 0, 0)

    if need_weights:
        attn_nle, wmean = tc_attention_with_weights(q_arr, k_arr, v_arr, sel,
                                                    block_q=block_q)
    else:
        attn_nle = tc_attention_flash(q_arr, k_arr, v_arr, sel,
                                      block_q=block_q, block_kv=block_kv)
        wmean = None

    # Output projection straight off the lane-dense (N, L, E) attention output.
    out = tc_linear(attn_nle.reshape(-1, E), params["o_w"], params["o_b"],
                    out_dtype=jnp.float32)
    out = out.reshape(N, L, E).transpose(1, 0, 2)            # -> (L, N, E)

    if need_weights:
        return out, jnp.transpose(wmean, (2, 1, 0))          # (N, L, S) -> (S, L, N)
    return out, None


# ---------------------------------------------------------------------------
# Pure-JAX reference (f32) for correctness checking
# ---------------------------------------------------------------------------
def mha_reference(params, query, key, value, num_heads):
    L, N, E = query.shape
    S = key.shape[0]
    H, Dh = num_heads, E // num_heads
    scaling = float(Dh) ** -0.5
    q = query.reshape(-1, E) @ params["q_w"].T + params["q_b"]
    k = key.reshape(-1, key.shape[-1]) @ params["k_w"].T + params["k_b"]
    v = value.reshape(-1, value.shape[-1]) @ params["v_w"].T + params["v_b"]
    q = q.reshape(L, N, H, Dh).transpose(1, 2, 0, 3) * scaling     # (N,H,L,Dh)
    k = k.reshape(S, N, H, Dh).transpose(1, 2, 0, 3)
    v = v.reshape(S, N, H, Dh).transpose(1, 2, 0, 3)
    s = jnp.einsum("nhld,nhsd->nhls", q, k)
    w = jax.nn.softmax(s, axis=-1)
    o = jnp.einsum("nhls,nhsd->nhld", w, v)
    o = o.transpose(0, 2, 1, 3).reshape(N, L, E)
    out = o.reshape(-1, E) @ params["o_w"].T + params["o_b"]
    out = out.reshape(N, L, E).transpose(1, 0, 2)                   # (L, N, E)
    wmean = jnp.transpose(w.mean(axis=1), (2, 1, 0))                # (S, L, N)
    return out, wmean


# ---------------------------------------------------------------------------
# Deterministic parameter init (Kaiming-uniform-like, shapes from __init__)
# ---------------------------------------------------------------------------
def init_params(key, embed_dim):
    E = embed_dim
    keys = jax.random.split(key, 8)
    bound_w = 1.0 / (E ** 0.5)   # kaiming_uniform(a=sqrt(5)) bound for fan_in=E
    bound_b = 1.0 / (E ** 0.5)

    def w(k):
        return jax.random.uniform(k, (E, E), jnp.float32, -bound_w, bound_w)

    def b(k):
        return jax.random.uniform(k, (E,), jnp.float32, -bound_b, bound_b)

    return {
        "q_w": w(keys[0]), "q_b": b(keys[1]),
        "k_w": w(keys[2]), "k_b": b(keys[3]),
        "v_w": w(keys[4]), "v_b": b(keys[5]),
        "o_w": w(keys[6]), "o_b": b(keys[7]),
    }


if __name__ == "__main__":
    embed_dim = 32
    num_heads = 4
    L = 8        # tgt_len
    N = 2        # batch

    root = jax.random.PRNGKey(0)
    kp, kx, kk, kv = jax.random.split(root, 4)
    params = init_params(kp, embed_dim)

    # --- Self-attention (query is key is value): fused QKV + weights kernel.
    x = jax.random.normal(kx, (L, N, embed_dim), jnp.float32)
    out, attn_w = mha_forward(params, x, x, x, num_heads, need_weights=True)
    jax.block_until_ready((out, attn_w))
    ref_out, ref_w = mha_reference(params, x, x, x, num_heads)

    assert out.shape == (L, N, embed_dim)
    assert attn_w.shape == (L, L, N)          # (S, T, N) with S == L
    assert bool(jnp.all(jnp.isfinite(out))) and bool(jnp.all(jnp.isfinite(attn_w)))
    assert bool(jnp.allclose(out, ref_out, atol=5e-2, rtol=5e-2))
    assert bool(jnp.allclose(attn_w, ref_w, atol=2e-2))
    assert bool(jnp.allclose(jnp.sum(attn_w, axis=0), 1.0, atol=1e-3))

    # --- Cross-attention with distinct key/value: separate projections + flash path
    #     (block_kv=8 with S=16 exercises the online-softmax accumulation).
    S = 16
    key_t = jax.random.normal(kk, (S, N, embed_dim), jnp.float32)
    val_t = jax.random.normal(kv, (S, N, embed_dim), jnp.float32)
    out2, w2 = mha_forward(params, x, key_t, val_t, num_heads,
                           need_weights=False, block_q=8, block_kv=8)
    jax.block_until_ready(out2)
    ref_out2, _ = mha_reference(params, x, key_t, val_t, num_heads)

    assert out2.shape == (L, N, embed_dim)
    assert w2 is None
    assert bool(jnp.all(jnp.isfinite(out2)))
    assert bool(jnp.allclose(out2, ref_out2, atol=5e-2, rtol=5e-2))

    print("KERNEL_OK")
</pallas_src>

<mosaic_0001>
module attributes {stable_mosaic.version = 11 : i64} {
  func.func @kernel(%arg0: i32, %arg1: i32, %arg2: i32, %arg3: memref<16x32xbf16, #tpu.memory_space<vmem>>, %arg4: memref<96x32xbf16, #tpu.memory_space<vmem>>, %arg5: memref<1x96xf32, #tpu.memory_space<vmem>>, %arg6: memref<16x96xbf16, #tpu.memory_space<vmem>>, %arg7: memref<16x96xf32, #tpu.memory_space<vmem>>) attributes {dimension_semantics = [#tpu.dimension_semantics<parallel>, #tpu.dimension_semantics<parallel>, #tpu.dimension_semantics<arbitrary>], iteration_bounds = array<i64: 1, 1, 1>, scalar_prefetch = 0 : i64, scratch_operands = 1 : i64, tpu.core_type = #tpu.core_type<tc>, window_params = [{transform_indices = @transform_0, window_bounds = array<i64: 16, 32>}, {transform_indices = @transform_1, window_bounds = array<i64: 96, 32>}, {transform_indices = @transform_2, window_bounds = array<i64: 1, 96>}, {transform_indices = @transform_3, window_bounds = array<i64: 16, 96>}]} {
    %c0_i32 = arith.constant 0 : i32
    %0 = arith.cmpi eq, %arg2, %c0_i32 : i32
    %1 = arith.extui %0 : i1 to i32
    %c0_i32_0 = arith.constant 0 : i32
    %2 = arith.cmpi ne, %1, %c0_i32_0 : i32
    scf.if %2 {
      %cst_10 = arith.constant 0.000000e+00 : f32
      %12 = vector.broadcast %cst_10 : f32 to vector<16x96xf32>
      %c0_11 = arith.constant 0 : index
      %c0_12 = arith.constant 0 : index
      %13 = vector.load %arg7[%c0_11, %c0_12] : memref<16x96xf32, #tpu.memory_space<vmem>>, vector<16x96xf32>
      tpu.vector_store %arg7[%c0_11, %c0_12], %12 {strides = array<i32>} : memref<16x96xf32, #tpu.memory_space<vmem>>, vector<16x96xf32>,
    } else {
    }
    %c0 = arith.constant 0 : index
    %c0_1 = arith.constant 0 : index
    %3 = vector.load %arg7[%c0, %c0_1] : memref<16x96xf32, #tpu.memory_space<vmem>>, vector<16x96xf32>
    %c0_2 = arith.constant 0 : index
    %c0_3 = arith.constant 0 : index
    %4 = vector.load %arg3[%c0_2, %c0_3] : memref<16x32xbf16, #tpu.memory_space<vmem>>, vector<16x32xbf16>
    %c0_4 = arith.constant 0 : index
    %c0_5 = arith.constant 0 : index
    %5 = vector.load %arg4[%c0_4, %c0_5] : memref<96x32xbf16, #tpu.memory_space<vmem>>, vector<96x32xbf16>
    %cst = arith.constant dense<0.000000e+00> : vector<16x96xf32>
    %6 = tpu.matmul %4, %5, %cst {dimension_numbers = #tpu.dot_dimension_numbers<[1], [1], [0], [0], [0, 0, 1, 0], [], []>} : vector<16x32xbf16>, vector<96x32xbf16>, vector<16x96xf32> -> vector<16x96xf32>
    %7 = arith.addf %3, %6 : vector<16x96xf32>
    %c0_6 = arith.constant 0 : index
    %c0_7 = arith.constant 0 : index
    %8 = vector.load %arg7[%c0_6, %c0_7] : memref<16x96xf32, #tpu.memory_space<vmem>>, vector<16x96xf32>
    tpu.vector_store %arg7[%c0_6, %c0_7], %7 {strides = array<i32>} : memref<16x96xf32, #tpu.memory_space<vmem>>, vector<16x96xf32>,
    %c0_i32_8 = arith.constant 0 : i32
    %9 = arith.cmpi eq, %arg2, %c0_i32_8 : i32
    %10 = arith.extui %9 : i1 to i32
    %c0_i32_9 = arith.constant 0 : i32
    %11 = arith.cmpi ne, %10, %c0_i32_9 : i32
    scf.if %11 {
      %c0_10 = arith.constant 0 : index
      %c0_11 = arith.constant 0 : index
      %12 = vector.load %arg7[%c0_10, %c0_11] : memref<16x96xf32, #tpu.memory_space<vmem>>, vector<16x96xf32>
      %c0_12 = arith.constant 0 : index
      %c0_13 = arith.constant 0 : index
      %13 = vector.load %arg5[%c0_12, %c0_13] : memref<1x96xf32, #tpu.memory_space<vmem>>, vector<1x96xf32>
      %14 = vector.broadcast %13 : vector<1x96xf32> to vector<16x96xf32>
      %15 = arith.addf %12, %14 : vector<16x96xf32>
      %16 = arith.truncf %15 : vector<16x96xf32> to vector<16x96xbf16>
      %c0_14 = arith.constant 0 : index
      %c0_15 = arith.constant 0 : index
      %17 = vector.load %arg6[%c0_14, %c0_15] : memref<16x96xbf16, #tpu.memory_space<vmem>>, vector<16x96xbf16>
      tpu.vector_store %arg6[%c0_14, %c0_15], %16 {strides = array<i32>} : memref<16x96xbf16, #tpu.memory_space<vmem>>, vector<16x96xbf16>,
    } else {
    }
    return
  }
  func.func @transform_0(%arg0: i32, %arg1: i32, %arg2: i32) -> (i32, i32) {
    %c0_i32 = arith.constant 0 : i32
    return %arg0, %arg2 : i32, i32
  }
  func.func @transform_1(%arg0: i32, %arg1: i32, %arg2: i32) -> (i32, i32) {
    %c0_i32 = arith.constant 0 : i32
    return %arg1, %arg2 : i32, i32
  }
  func.func @transform_2(%arg0: i32, %arg1: i32, %arg2: i32) -> (i32, i32) {
    %c0_i32 = arith.constant 0 : i32
    %c0_i32_0 = arith.constant 0 : i32
    return %c0_i32, %arg1 : i32, i32
  }
  func.func @transform_3(%arg0: i32, %arg1: i32, %arg2: i32) -> (i32, i32) {
    %c0_i32 = arith.constant 0 : i32
    return %arg0, %arg1 : i32, i32
  }
}

</mosaic_0001>

<bundles_post_ra>
// kernel: tpu_custom_call.1
= control target key start
LH: loop header
LB: loop body
LE: loop exit
PB: predicated region body
PF: predicated region fallthrough
CT: control target
= control target key end

     0   :  { %vm74_vm0 = vcmask 261120   ;;  %s278_s0 = inlined_call_operand.vmem [shape: bf16[16,32], index: 0, kind: input, shape index: {}]   ;;  %s279_s1 = inlined_call_operand.vmem [shape: bf16[96,32], index: 1, kind: input, shape index: {}]   ;;  %s280_s2 = inlined_call_operand.vmem [shape: f32[1,96], index: 2, kind: input, shape index: {}]   ;;  %s281_s3 = inlined_call_operand.hbm [shape: bf16[16,96], index: 3, kind: output, shape index: {}]  }
   0x1   :  { %v184_v0 = vld [vmem:[%s279_s1 + $0x28] sm:$0xff] }
   0x2   :  { %8 = vsyncpa [#allocation4], 0  ;;  %v94_v1 = vsel %vm74_vm0, %v184_v0, 0  ;;  %v183_v2 = vld [vmem:[%s279_s1 + $0x20] sm:$0xff]  ;;  %v182_v4 = vld [vmem:[%s279_s1 + $0x18] sm:$0xff]  ;;  %vm20_vm1 = vcmask 785408  }
   0x3   :  { %98 = vmatpush.bf16.xpose.msra.mxu0 %v94_v1  ;;  %v91_v3 = vsel %vm74_vm0, %v183_v2, 0  ;;  %v88_v5 = vsel %vm74_vm0, %v182_v4, 0  ;;  %v216_v6 = vmov 0.0   ;;  %v181_v7 = vld [vmem:[%s279_s1 + $0x10] sm:$0xff]  ;;  %v180_v9 = vld [vmem:[%s279_s1 + $0x8] sm:$0xff]  ;;  %v179_v11 = vld [vmem:[%s279_s1] sm:$0xff] }
   0x4   :  { %21 = vst.msk [vmem:[#allocation2] sm:$0xff] %vm20_vm1, %v216_v6  ;;  %v85_v8 = vsel %vm74_vm0, %v181_v7, 0  ;;  %v82_v10 = vsel %vm74_vm0, %v180_v9, 0  ;;  %v79_v12 = vsel %vm74_vm0, %v179_v11, 0  ;;  %v178_v13 = vld [vmem:[%s278_s0] sm:$0xff]  ;;  %vm128_vm2 = vcmask 781312  }
   0x5   :  { %22 = vst.msk [vmem:[#allocation2 + $0x8] sm:$0xff] %vm20_vm1, %v216_v6  ;;  %v189_v18 = vld [vmem:[%s280_s2] ss:$0 sm:$0xff]  ;;  %s217_s0 = smov [#allocation3]   ;;  %s137_s30 = sshll.u32 %s281_s3, 4  ;;  %s138_s30 = int_to_ptr.hbm [resolvable:$true] %s137_s30 }
   0x6   :  { %s135_s1 = sshll.u32 %s217_s0, 4  ;;  %s218_s2 = smov 64   ;;  %s136_s1 = int_to_ptr.vmem [resolvable:$true] %s135_s1 }
   0x7   :  { %s219_s4 = smov 4  }
   0xb   :  { %99 = vmatpush.bf16.xpose.msra.mxu0 %v91_v3  ;;  %v23_v14 = vld [vmem:[#allocation2] sm:$0xff] }
   0xc   :  { %v24_v17 = vld [vmem:[#allocation2 + $0x8] sm:$0xff] }
  0x13   :  { %100 = vmatpush.bf16.xpose.msra.mxu0 %v88_v5 }
  0x1b   :  { %101 = vmatpush.bf16.xpose.msra.mxu0 %v85_v8 }
  0x23   :  { %102 = vmatpush.bf16.xpose.msra.mxu0 %v82_v10 }
  0x2b   :  { %103 = vmatpush.bf16.xpose.msra.mxu0 %v79_v12 }
  0x32   :  { %177 = vmatmul.msk.bf16.vlgmr.msra.gmra.mxu0 %vm74_vm0, %v178_v13 }
  0xaf   :  { %v105_v15 = vpop.f32.mrf.mxu0 }
  0xb0   :  { %v110_v16 = vadd.f32 %v105_v15, %v23_v14 }
  0xb2   :  { %113 = vst.msk [vmem:[#allocation2] sm:$0xff] %vm20_vm1, %v110_v16 }
  0xb7   :  { %v107_v19 = vpop.f32.mrf.mxu0 }
  0xb8   :  { %v111_v20 = vadd.f32 %v107_v19, %v24_v17 }
  0xb9   :  { %v118_v21 = vld [vmem:[#allocation2] sm:$0xff] }
  0xba   :  { %114 = vst.msk [vmem:[#allocation2 + $0x8] sm:$0xff] %vm20_vm1, %v111_v20  ;;  %v124_v22 = vadd.f32 %v189_v18, %v118_v21 }
  0xbc   :  { %v126_v23 = vpack.c.bf16 %v124_v22, %v124_v22 }
  0xbe   :  { %129 = vst.msk [vmem:[#allocation3] sm:$0xf] %vm128_vm2, %v126_v23 }
  0xc1   :  { %v119_v24 = vld [vmem:[#allocation2 + $0x8] sm:$0xff] }
  0xc2   :  { %v125_v25 = vadd.f32 %v189_v18, %v119_v24 }
  0xc4   :  { %v127_v26 = vpack.c.bf16 %v125_v25, %v125_v25 }
  0xc6   :  { %130 = vst.msk [vmem:[#allocation3 + $0x4] sm:$0xf] %vm128_vm2, %v127_v26 }
  0xc7   :  { %143 = dma.vmem_to_hbm [thread:$0]  %s136_s1, 128, %s138_s30, [#allocation4], %s218_s2, %s218_s2, %s219_s4  }
  0xc8   :  { %214 = dma.done.wait [#allocation4], 128  }
  0xc9   :  { %215 = vsyncadd [#allocation4], 4294967168 }
  0xca   :  { %148 = vsyncpa [#allocation4], 1 }

</bundles_post_ra>
